<compile_context>
chip_gen: v7x
topology: tpu7x:2x2x1
jax: 0.10.0
libtpu: 0.0.40
codegen_flags: <defaults>
</compile_context>

<pallas_src>
import math

import jax
import jax.numpy as jnp
from jax.experimental import pallas as pl
from jax.experimental.pallas import tpu as pltpu


# ----------------------------------------------------------------------------
# Kernels
# ----------------------------------------------------------------------------
def _td_dense_kernel_single_k(d_ref, w_ref, b_ref, o_ref):
    """Whole-K fast path: d (tm, K) @ w (K, tn) + b -> exp(-relu(.))."""
    z = jnp.dot(d_ref[...], w_ref[...],
                preferred_element_type=jnp.float32) + b_ref[...]
    o_ref[...] = jnp.exp(-jnp.maximum(z, 0.0)).astype(o_ref.dtype)


def _td_dense_kernel_acc_out(d_ref, w_ref, b_ref, o_ref):
    """Multi-K path, f32 output: accumulate directly into the resident o_ref."""
    k = pl.program_id(2)

    @pl.when(k == 0)
    def _():
        o_ref[...] = jnp.zeros_like(o_ref)

    o_ref[...] += jnp.dot(d_ref[...], w_ref[...],
                          preferred_element_type=jnp.float32)

    @pl.when(k == pl.num_programs(2) - 1)
    def _():
        o_ref[...] = jnp.exp(-jnp.maximum(o_ref[...] + b_ref[...], 0.0))


def _td_dense_kernel_acc_scratch(d_ref, w_ref, b_ref, o_ref, acc_ref):
    """Multi-K path, non-f32 output: f32 VMEM scratch accumulator."""
    k = pl.program_id(2)

    @pl.when(k == 0)
    def _():
        acc_ref[...] = jnp.zeros_like(acc_ref)

    acc_ref[...] += jnp.dot(d_ref[...], w_ref[...],
                            preferred_element_type=jnp.float32)

    @pl.when(k == pl.num_programs(2) - 1)
    def _():
        z = acc_ref[...] + b_ref[...]
        o_ref[...] = jnp.exp(-jnp.maximum(z, 0.0)).astype(o_ref.dtype)


def _td_diag_kernel(d_ref, wdiag_ref, b_ref, o_ref):
    """diag=True path: purely elementwise exp(-relu(d * diag(W) + b)), VPU only."""
    z = d_ref[...].astype(jnp.float32) * wdiag_ref[...] + b_ref[...]
    o_ref[...] = jnp.exp(-jnp.maximum(z, 0.0)).astype(o_ref.dtype)


# ----------------------------------------------------------------------------
# Tile selection helpers
# ----------------------------------------------------------------------------
def _round_up(x, m):
    return ((x + m - 1) // m) * m


def _pick_tile(dim, cap, align, waste=0.125):
    """Largest tile <= cap (multiple of `align`) keeping pad waste bounded."""
    cap = max(align, (cap // align) * align)
    full = _round_up(dim, align)
    if full <= cap:
        return full
    limit = full * (1.0 + waste)   # smallest achievable padded size is `full`
    for t in range(cap, align - 1, -align):
        if _round_up(dim, t) <= limit:
            return t
    return align


def _device_kind():
    try:
        return jax.devices()[0].device_kind.lower()
    except Exception:  # pragma: no cover - e.g. no device during tracing
        return ""


def _dense_tile_caps(compute_bytes):
    """(tm_cap, tn_cap, tk_cap) whose double-buffered footprint fits every
    generation's default scoped VMEM (v5e 16 MiB is the tightest)."""
    kind = _device_kind()
    is_v5e = ("v5 lite" in kind) or ("v5e" in kind) or ("v5litepod" in kind)
    if compute_bytes <= 2:                       # bf16 MXU inputs
        return (256, 1024, 1024) if is_v5e else (256, 1024, 2048)
    return (256, 512, 1024) if is_v5e else (256, 1024, 1024)


# ----------------------------------------------------------------------------
# One-time parameter preparation (pad / relayout / cast W, pad b)
# ----------------------------------------------------------------------------
def prepare_temporal_decay(W, b, diag=False, *, compute_dtype=jnp.bfloat16,
                           tm_cap=None, tn_cap=None, tk_cap=None):
    """Pad / relayout / cast the parameters once so the per-call path only
    touches d. Returns a dict consumed by `temporal_decay_apply`."""
    W = jnp.asarray(W, jnp.float32)
    b = jnp.asarray(b, jnp.float32)
    Out, In = W.shape
    assert b.shape == (Out,)

    if diag:
        assert In == Out, "diag=True requires input_size == output_size"
        tn = _pick_tile(Out, tn_cap or 2048, 128)
        Np = _round_up(Out, tn)
        wdiag = jnp.pad(jnp.diagonal(W), (0, Np - Out)).reshape(1, Np)
        b_p = jnp.pad(b, (0, Np - Out)).reshape(1, Np)
        return dict(diag=True, In=In, Out=Out, tn=tn, Np=Np,
                    tm_cap=(tm_cap or 512), wdiag=wdiag, b=b_p)

    cdtype = jnp.dtype(compute_dtype)
    cbytes = cdtype.itemsize
    tm_def, tn_def, tk_def = _dense_tile_caps(cbytes)
    tm_cap = tm_cap or tm_def
    tn_cap = tn_cap or tn_def
    tk_cap = tk_cap or tk_def

    tn = _pick_tile(Out, tn_cap, 128)
    tk = _pick_tile(In, tk_cap, 128)
    Np = _round_up(Out, tn)
    Kp = _round_up(In, tk)

    # W kept transposed as (In, Out): the MXU consumes (tk, tn) directly,
    # no per-tile XLU transpose. Pad + cast paid once here.
    W_T = jnp.pad(W.T, ((0, Kp - In), (0, Np - Out))).astype(cdtype)
    b_p = jnp.pad(b, (0, Np - Out)).reshape(1, Np)   # bias stays f32

    return dict(diag=False, In=In, Out=Out, tn=tn, tk=tk, Np=Np, Kp=Kp,
                tm_cap=tm_cap, compute_dtype=cdtype, cbytes=cbytes,
                W_T=W_T, b=b_p)


# ----------------------------------------------------------------------------
# Forward
# ----------------------------------------------------------------------------
def temporal_decay_apply(params, d):
    """gamma = exp(-relu(d @ W.T + b)) using the prepared params."""
    p = params
    d = jnp.asarray(d)
    B, In = d.shape
    assert In == p["In"]
    out_dtype = d.dtype

    if p["diag"]:
        tn, Np = p["tn"], p["Np"]
        tm = _pick_tile(B, p["tm_cap"], 8)
        Bp = _round_up(B, tm)
        d_p = d if (Bp == B and Np == In) else jnp.pad(
            d, ((0, Bp - B), (0, Np - In)))
        out = pl.pallas_call(
            _td_diag_kernel,
            out_shape=jax.ShapeDtypeStruct((Bp, Np), out_dtype),
            grid_spec=pltpu.PrefetchScalarGridSpec(
                num_scalar_prefetch=0,
                grid=(Bp // tm, Np // tn),
                in_specs=[
                    pl.BlockSpec((tm, tn), lambda i, j: (i, j)),
                    pl.BlockSpec((1, tn), lambda i, j: (0, j)),
                    pl.BlockSpec((1, tn), lambda i, j: (0, j)),
                ],
                out_specs=pl.BlockSpec((tm, tn), lambda i, j: (i, j)),
            ),
            compiler_params=pltpu.CompilerParams(
                dimension_semantics=("parallel", "parallel")),
        )(d_p, p["wdiag"], p["b"])
        return out[:B, :p["Out"]]

    # ---- dense path ----
    tn, tk, Np, Kp = p["tn"], p["tk"], p["Np"], p["Kp"]
    sub_align = 16 if p["cbytes"] == 2 else 8       # bf16 packs 16 rows / vreg
    tm = _pick_tile(B, p["tm_cap"], sub_align)
    Bp = _round_up(B, tm)

    d_p = d if (Bp == B and Kp == In) else jnp.pad(
        d, ((0, Bp - B), (0, Kp - In)))
    d_p = d_p.astype(p["compute_dtype"])

    nk = Kp // tk
    grid_mn = (Bp // tm, Np // tn)

    if nk == 1:
        # Small-K fast path: no K grid axis, no accumulator, no pl.when.
        out = pl.pallas_call(
            _td_dense_kernel_single_k,
            out_shape=jax.ShapeDtypeStruct((Bp, Np), out_dtype),
            grid_spec=pltpu.PrefetchScalarGridSpec(
                num_scalar_prefetch=0,
                grid=grid_mn,
                in_specs=[
                    pl.BlockSpec((tm, Kp), lambda i, j: (i, 0)),
                    pl.BlockSpec((Kp, tn), lambda i, j: (0, j)),
                    pl.BlockSpec((1, tn), lambda i, j: (0, j)),
                ],
                out_specs=pl.BlockSpec((tm, tn), lambda i, j: (i, j)),
            ),
            compiler_params=pltpu.CompilerParams(
                dimension_semantics=("parallel", "parallel")),
        )(d_p, p["W_T"], p["b"])
        return out[:B, :p["Out"]]

    # Multi-K: reduction last, resident output block across k.
    in_specs = [
        pl.BlockSpec((tm, tk), lambda i, j, k: (i, k)),
        pl.BlockSpec((tk, tn), lambda i, j, k: (k, j)),
        pl.BlockSpec((1, tn), lambda i, j, k: (0, j)),
    ]
    out_spec = pl.BlockSpec((tm, tn), lambda i, j, k: (i, j))
    cp = pltpu.CompilerParams(
        dimension_semantics=("parallel", "parallel", "arbitrary"))

    if out_dtype == jnp.float32:
        # Accumulate directly into the resident f32 output block (no scratch).
        out = pl.pallas_call(
            _td_dense_kernel_acc_out,
            out_shape=jax.ShapeDtypeStruct((Bp, Np), jnp.float32),
            grid_spec=pltpu.PrefetchScalarGridSpec(
                num_scalar_prefetch=0,
                grid=grid_mn + (nk,),
                in_specs=in_specs,
                out_specs=out_spec,
            ),
            compiler_params=cp,
        )(d_p, p["W_T"], p["b"])
    else:
        out = pl.pallas_call(
            _td_dense_kernel_acc_scratch,
            out_shape=jax.ShapeDtypeStruct((Bp, Np), out_dtype),
            grid_spec=pltpu.PrefetchScalarGridSpec(
                num_scalar_prefetch=0,
                grid=grid_mn + (nk,),
                in_specs=in_specs,
                out_specs=out_spec,
                scratch_shapes=[pltpu.VMEM((tm, tn), jnp.float32)],
            ),
            compiler_params=cp,
        )(d_p, p["W_T"], p["b"])
    return out[:B, :p["Out"]]


def temporal_decay(d, W, b, diag=False, *, compute_dtype=jnp.bfloat16,
                   tm_cap=None, tn_cap=None, tk_cap=None):
    """Convenience one-shot wrapper. For repeated calls with the same weights,
    call prepare_temporal_decay() once and temporal_decay_apply() per step."""
    params = prepare_temporal_decay(W, b, diag, compute_dtype=compute_dtype,
                                    tm_cap=tm_cap, tn_cap=tn_cap, tk_cap=tk_cap)
    return temporal_decay_apply(params, d)


# ----------------------------------------------------------------------------
# Param init mirroring PyTorch reset_parameters()
# ----------------------------------------------------------------------------
def init_temporal_decay_params(key, input_size, output_size):
    stdv = 1.0 / math.sqrt(output_size)
    kW, kb = jax.random.split(key)
    W = jax.random.uniform(kW, (output_size, input_size),
                           minval=-stdv, maxval=stdv, dtype=jnp.float32)
    b = jax.random.uniform(kb, (output_size,),
                           minval=-stdv, maxval=stdv, dtype=jnp.float32)
    return W, b


def _reference(d, W, b, diag=False):
    Wm = W * jnp.eye(W.shape[0], dtype=W.dtype) if diag else W
    g = jnp.maximum(d @ Wm.T + b, 0.0)
    return jnp.exp(-g)


if __name__ == "__main__":
    key = jax.random.PRNGKey(0)
    k_d, k_p1, k_p2, k_d2, k_p3 = jax.random.split(key, 5)

    # S4M-like small shapes.
    batch, input_size, output_size = 8, 32, 32
    d = jax.random.uniform(k_d, (batch, input_size), dtype=jnp.float32)

    # Dense (diag=False), bf16 MXU inputs with f32 accumulation (default).
    W, b = init_temporal_decay_params(k_p1, input_size, output_size)
    ref = _reference(d, W, b, diag=False)
    gamma = jax.block_until_ready(temporal_decay(d, W, b, diag=False))
    assert gamma.shape == (batch, output_size)
    assert jnp.allclose(gamma, ref, atol=2e-2, rtol=2e-2), \
        float(jnp.max(jnp.abs(gamma - ref)))

    # Dense, f32 compute path (bit-faithful to PyTorch numerics).
    gamma32 = jax.block_until_ready(
        temporal_decay(d, W, b, diag=False, compute_dtype=jnp.float32))
    assert jnp.allclose(gamma32, ref, atol=1e-5, rtol=1e-5)

    # diag=True path (input_size == output_size), pure VPU kernel.
    Wd, bd = init_temporal_decay_params(k_p2, input_size, output_size)
    gamma_d = jax.block_until_ready(temporal_decay(d, Wd, bd, diag=True))
    ref_d = _reference(d, Wd, bd, diag=True)
    assert gamma_d.shape == (batch, output_size)
    assert jnp.allclose(gamma_d, ref_d, atol=1e-5, rtol=1e-5)

    # Multi-K-step dense path (forced small tk) exercising the resident-output
    # accumulator kernel; prepare-once / apply style.
    B2, In2, Out2 = 16, 384, 256
    d2 = jax.random.uniform(k_d2, (B2, In2), dtype=jnp.float32)
    W2, b2 = init_temporal_decay_params(k_p3, In2, Out2)
    prep = prepare_temporal_decay(W2, b2, diag=False,
                                  compute_dtype=jnp.float32, tk_cap=128)
    gamma2 = jax.block_until_ready(temporal_decay_apply(prep, d2))
    ref2 = _reference(d2, W2, b2, diag=False)
    assert jnp.allclose(gamma2, ref2, atol=1e-4, rtol=1e-4)

    # TODO(synk): for tiny grids on v7x, optionally split the Out axis in two so
    # both TensorCores get work; irrelevant at these demo shapes.

    print("KERNEL_OK")
</pallas_src>

<mosaic_0001>
module attributes {stable_mosaic.version = 11 : i64} {
  func.func @_td_dense_kernel_single_k(%arg0: i32, %arg1: i32, %arg2: memref<16x128xbf16, #tpu.memory_space<vmem>>, %arg3: memref<128x128xbf16, #tpu.memory_space<vmem>>, %arg4: memref<1x128xf32, #tpu.memory_space<vmem>>, %arg5: memref<16x128xf32, #tpu.memory_space<vmem>>) attributes {dimension_semantics = [#tpu.dimension_semantics<parallel>, #tpu.dimension_semantics<parallel>], iteration_bounds = array<i64: 1, 1>, scalar_prefetch = 0 : i64, scratch_operands = 0 : i64, tpu.core_type = #tpu.core_type<tc>, window_params = [{transform_indices = @transform_0, window_bounds = array<i64: 16, 128>}, {transform_indices = @transform_1, window_bounds = array<i64: 128, 128>}, {transform_indices = @transform_2, window_bounds = array<i64: 1, 128>}, {transform_indices = @transform_3, window_bounds = array<i64: 16, 128>}]} {
    %c0 = arith.constant 0 : index
    %c0_0 = arith.constant 0 : index
    %0 = vector.load %arg2[%c0, %c0_0] : memref<16x128xbf16, #tpu.memory_space<vmem>>, vector<16x128xbf16>
    %c0_1 = arith.constant 0 : index
    %c0_2 = arith.constant 0 : index
    %1 = vector.load %arg3[%c0_1, %c0_2] : memref<128x128xbf16, #tpu.memory_space<vmem>>, vector<128x128xbf16>
    %cst = arith.constant dense<0.000000e+00> : vector<16x128xf32>
    %2 = tpu.matmul %0, %1, %cst {dimension_numbers = #tpu.dot_dimension_numbers<[1], [0], [0], [1], [0, 0, 1, 1], [], []>} : vector<16x128xbf16>, vector<128x128xbf16>, vector<16x128xf32> -> vector<16x128xf32>
    %c0_3 = arith.constant 0 : index
    %c0_4 = arith.constant 0 : index
    %3 = vector.load %arg4[%c0_3, %c0_4] : memref<1x128xf32, #tpu.memory_space<vmem>>, vector<1x128xf32>
    %4 = vector.broadcast %3 : vector<1x128xf32> to vector<16x128xf32>
    %5 = arith.addf %2, %4 : vector<16x128xf32>
    %cst_5 = arith.constant 0.000000e+00 : f32
    %6 = vector.broadcast %cst_5 : f32 to vector<16x128xf32>
    %7 = arith.maximumf %5, %6 : vector<16x128xf32>
    %cst_6 = arith.constant 0.000000e+00 : f32
    %8 = vector.broadcast %cst_6 : f32 to vector<16x128xf32>
    %9 = arith.subf %8, %7 : vector<16x128xf32>
    %10 = math.exp %9 : vector<16x128xf32>
    %c0_7 = arith.constant 0 : index
    %c0_8 = arith.constant 0 : index
    %11 = vector.load %arg5[%c0_7, %c0_8] : memref<16x128xf32, #tpu.memory_space<vmem>>, vector<16x128xf32>
    tpu.vector_store %arg5[%c0_7, %c0_8], %10 {strides = array<i32>} : memref<16x128xf32, #tpu.memory_space<vmem>>, vector<16x128xf32>,
    return
  }
  func.func @transform_0(%arg0: i32, %arg1: i32) -> (i32, i32) {
    %c0_i32 = arith.constant 0 : i32
    %c0_i32_0 = arith.constant 0 : i32
    return %arg0, %c0_i32 : i32, i32
  }
  func.func @transform_1(%arg0: i32, %arg1: i32) -> (i32, i32) {
    %c0_i32 = arith.constant 0 : i32
    %c0_i32_0 = arith.constant 0 : i32
    return %c0_i32, %arg1 : i32, i32
  }
  func.func @transform_2(%arg0: i32, %arg1: i32) -> (i32, i32) {
    %c0_i32 = arith.constant 0 : i32
    %c0_i32_0 = arith.constant 0 : i32
    return %c0_i32, %arg1 : i32, i32
  }
  func.func @transform_3(%arg0: i32, %arg1: i32) -> (i32, i32) {
    %c0_i32 = arith.constant 0 : i32
    return %arg0, %arg1 : i32, i32
  }
}

</mosaic_0001>

<bundles_post_ra>
// kernel: tpu_custom_call.1
= control target key start
LH: loop header
LB: loop body
LE: loop exit
PB: predicated region body
PF: predicated region fallthrough
CT: control target
= control target key end

     0   :  { %8 = vsyncpa [#allocation3], 0  ;;  %s393_s0 = inlined_call_operand.hbm [shape: bf16[16,128], index: 0, kind: input, shape index: {}]   ;;  %s394_s1 = inlined_call_operand.hbm [shape: bf16[128,128], index: 1, kind: input, shape index: {}]   ;;  %s395_s2 = inlined_call_operand.vmem [shape: f32[1,128], index: 2, kind: input, shape index: {}]   ;;  %s396_s3 = inlined_call_operand.hbm [shape: f32[16,128], index: 3, kind: output, shape index: {}]  }
   0x1   :  { %9 = vsyncpa [#allocation6], 0 }
   0x2   :  { %10 = vsyncpa [#allocation4], 0  ;;  %s325_s12 = smov [#allocation2]   ;;  %s253_s16 = scalar_lea.hbm %s393_s0, 128 }
   0x3   :  { %s16_s13 = sshll.u32 %s325_s12, 4  ;;  %p254_p0 = scmp.ne.s32.totalorder %s393_s0, %s253_s16  ;;  %s17_s13 = int_to_ptr.vmem [resolvable:$true] %s16_s13 }
   0x4   :  { %p257_p1 = scmp.lt.u32.totalorder %s253_s16, %s393_s0 }
   0x6   :  { %p259_p2 = pnand %p257_p1, %p254_p0 }
   0x8   :  { %262 = shalt.err (!%p259_p2)
}
   0x9   :  { %s263_s21 = scalar_lea.vmem %s17_s13, 128  ;;  %p268_p4 = scmp.lt.s32.totalorder %s17_s13, %s17_s13 }
   0xa   :  { %p264_p3 = scmp.ne.s32.totalorder %s17_s13, %s263_s21  ;;  %p269_p5 = scmp.lt.s32.totalorder %s263_s21, %s263_s21 }
   0xc   :  { %p270_p6 = por %p269_p5, %p268_p4 }
   0xe   :  { %p271_p7 = pnand %p270_p6, %p264_p3 }
  0x10   :  { %274 = shalt.err (!%p271_p7)
}
  0x11   :  { %s326_s22 = smov 64   ;;  %s327_s23 = smov 4  }
  0x12   :  { %22 = dma.hbm_to_vmem [thread:$0]  %s393_s0, 128, %s17_s13, [#allocation3], %s326_s22, %s326_s22, %s327_s23  }
  0x13   :  { %s328_s26 = smov [#allocation5]   ;;  %s275_s30 = scalar_lea.hbm %s394_s1, 1024 }
  0x14   :  { %s28_s27 = sshll.u32 %s328_s26, 4  ;;  %p276_p8 = scmp.ne.s32.totalorder %s394_s1, %s275_s30  ;;  %s29_s27 = int_to_ptr.vmem [resolvable:$true] %s28_s27 }
  0x15   :  { %p279_p9 = scmp.lt.u32.totalorder %s275_s30, %s394_s1 }
  0x17   :  { %p281_p10 = pnand %p279_p9, %p276_p8 }
  0x19   :  { %284 = shalt.err (!%p281_p10)
}
  0x1a   :  { %s285_s8 = scalar_lea.vmem %s29_s27, 1024  ;;  %p290_p12 = scmp.lt.s32.totalorder %s29_s27, %s29_s27 }
  0x1b   :  { %p286_p11 = scmp.ne.s32.totalorder %s29_s27, %s285_s8  ;;  %p291_p13 = scmp.lt.s32.totalorder %s285_s8, %s285_s8 }
  0x1d   :  { %p292_p0 = por %p291_p13, %p290_p12 }
  0x1f   :  { %p293_p1 = pnand %p292_p0, %p286_p11 }
  0x21   :  { %296 = shalt.err (!%p293_p1)
}
  0x22   :  { %34 = dma.hbm_to_vmem [thread:$0]  %s394_s1, 1024, %s29_s27, [#allocation6], %s326_s22, %s326_s22, %s327_s23  }
  0x23   :  { %319 = dma.done.wait [#allocation3], 128  }
  0x24   :  { %320 = vsyncadd [#allocation3], 4294967168 }
  0x25   :  { %321 = dma.done.wait [#allocation6], 1024  }
  0x26   :  { %322 = vsyncadd [#allocation6], 4294966272  ;;  %v329_v0 = vmov 0.0   ;;  %vm330_vm0 = vmmov 0   ;;  %v240_v1 = vld [vmem:[#allocation5] sm:$0xff]   ;;  %v241_v2 = vld [vmem:[#allocation5 + $0x8] sm:$0xff]  }
  0x27   :  { %211 = vmatprep.subr.bf16.mxu0 %v329_v0  ;;  %227 = vmatprep.mubr.msk.bf16.mxu0 %vm330_vm0, %v329_v0  ;;  %v242_v3 = vld [vmem:[#allocation5 + $0x10] sm:$0xff]   ;;  %v243_v4 = vld [vmem:[#allocation5 + $0x18] sm:$0xff]   ;;  %v244_v5 = vld [vmem:[#allocation5 + $0x20] sm:$0xff]   ;;  %s331_s11 = smov [#allocation7]  }
  0x28   :  { %212 = vmatpush3.bf16.msra.mxu0 %v240_v1  ;;  %v245_v6 = vld [vmem:[#allocation5 + $0x28] sm:$0xff]   ;;  %v246_v7 = vld [vmem:[#allocation5 + $0x30] sm:$0xff]   ;;  %v247_v8 = vld [vmem:[#allocation5 + $0x38] sm:$0xff]   ;;  %s179_s12 = sshll.u32 %s331_s11, 4  ;;  %s180_s12 = int_to_ptr.vmem [resolvable:$true] %s179_s12 }
  0x29   :  { %213 = vmatprep.subr.bf16.mxu0 %v329_v0  ;;  %v248_v9 = vld [vmem:[#allocation2] sm:$0xff]   ;;  %p302_p3 = scmp.lt.s32.totalorder %s180_s12, %s180_s12 }
  0x2a   :  { %v192_v10 = vld [vmem:[%s395_s2] ss:$0 sm:$0xff]  ;;  %s297_s2 = scalar_lea.vmem %s180_s12, 256 }
  0x2b   :  { %p298_p2 = scmp.ne.s32.totalorder %s180_s12, %s297_s2  ;;  %p303_p4 = scmp.lt.s32.totalorder %s297_s2, %s297_s2 }
  0x2c   :  { %214 = vmatpush3.bf16.msra.mxu0 %v241_v2 }
  0x2d   :  { %215 = vmatprep.subr.bf16.mxu0 %v329_v0  ;;  %p304_p5 = por %p303_p4, %p302_p3 }
  0x2f   :  { %p305_p6 = pnand %p304_p5, %p298_p2 }
  0x30   :  { %216 = vmatpush3.bf16.msra.mxu0 %v242_v3 }
  0x31   :  { %217 = vmatprep.subr.bf16.mxu0 %v329_v0 }
  0x34   :  { %218 = vmatpush3.bf16.msra.mxu0 %v243_v4 }
  0x35   :  { %219 = vmatprep.subr.bf16.mxu0 %v329_v0 }
  0x38   :  { %220 = vmatpush3.bf16.msra.mxu0 %v244_v5 }
  0x39   :  { %221 = vmatprep.subr.bf16.mxu0 %v329_v0 }
  0x3c   :  { %222 = vmatpush3.bf16.msra.mxu0 %v245_v6 }
  0x3d   :  { %223 = vmatprep.subr.bf16.mxu0 %v329_v0 }
  0x40   :  { %224 = vmatpush3.bf16.msra.mxu0 %v246_v7 }
  0x41   :  { %225 = vmatprep.subr.bf16.mxu0 %v329_v0 }
  0x44   :  { %226 = vmatpush3.bf16.msra.mxu0 %v247_v8 }
  0x47   :  { %228 = vmatmul.mubr.bf16.vlgmr.msra.gmra.mrb[0].mxu0 %v248_v9 }
 0x11a   :  { %v157_v11 = vpop.f32.mrb[0].mxu0 }
 0x11b   :  { %v158_v12 = vadd.f32 %v192_v10, %v157_v11  ;;  %v229_v13 = vpop.f32.mrb[1].mxu0 }
 0x11c   :  { %v160_v14 = vpop.f32.mrb[2].mxu0 }
 0x11d   :  { %v164_v15 = vmax.f32 %v158_v12, 0.0  ;;  %v161_v16 = vadd.f32 %v192_v10, %v160_v14  ;;  %v230_v17 = vpop.f32.mrb[3].mxu0 }
 0x11f   :  { %v166_v18 = vsub.f32 0.0, %v164_v15  ;;  %v165_v19 = vmax.f32 %v161_v16, 0.0 }
 0x121   :  { %v168_v20 = vmul.f32 1.442695, %v166_v18  ;;  %v167_v21 = vsub.f32 0.0, %v165_v19 }
 0x123   :  { %249 = vpow2.f32 %v168_v20  ;;  %v170_v22 = vmul.f32 1.442695, %v167_v21 }
 0x125   :  { %251 = vpow2.f32 %v170_v22 }
 0x12d   :  { %v250_v23 = vpop.eup %249 }
 0x12e   :  { %172 = vst [vmem:[#allocation7] sm:$0xff] %v250_v23 }
 0x12f   :  { %v252_v24 = vpop.eup %251 }
 0x130   :  { %173 = vst [vmem:[#allocation7 + $0x8] sm:$0xff] %v252_v24 }
 0x131   :  { %308 = shalt.err (!%p305_p6)
}
 0x132   :  { %s309_s15 = scalar_lea.hbm %s396_s3, 256 }
 0x133   :  { %p310_p7 = scmp.ne.s32.totalorder %s396_s3, %s309_s15  ;;  %p313_p8 = scmp.lt.u32.totalorder %s309_s15, %s396_s3 }
 0x135   :  { %p315_p9 = pnand %p313_p8, %p310_p7 }
 0x137   :  { %318 = shalt.err (!%p315_p9)
}
 0x138   :  { %s332_s20 = smov 128   ;;  %s333_s21 = smov 8  }
 0x139   :  { %185 = dma.vmem_to_hbm [thread:$0]  %s180_s12, 256, %s396_s3, [#allocation4], %s332_s20, %s332_s20, %s333_s21  }
 0x13a   :  { %323 = dma.done.wait [#allocation4], 256  }
 0x13b   :  { %324 = vsyncadd [#allocation4], 4294967040 }
 0x13c   :  { %189 = vsyncpa [#allocation3], 1 }
 0x13d   :  { %190 = vsyncpa [#allocation6], 1 }
 0x13e   :  { %191 = vsyncpa [#allocation4], 1 }

</bundles_post_ra>
